<compile_context>
chip_gen: v7x
topology: tpu7x:2x2x1
jax: 0.10.0
libtpu: 0.0.40
codegen_flags: <defaults>
</compile_context>

<pallas_src>
import math
import functools

import jax
import jax.numpy as jnp
from jax.experimental import pallas as pl
from jax.experimental.pallas import tpu as pltpu


def _pos_embed_kernel(x_ref, out_ref, *, f_tile, num_feats, log_temp):
    # x_ref   : (b_tile, 1, L_pad)      f32  normalized cumsum positions
    # out_ref : (b_tile, f_tile, L_pad) f32  output block, lane-dense in L
    f_base = (pl.program_id(1) * f_tile).astype(jnp.float32)
    f_idx = (
        jax.lax.broadcasted_iota(jnp.int32, (1, f_tile, 1), 1).astype(jnp.float32)
        + f_base
    )                                                     # (1, f_tile, 1)
    half = jnp.floor(f_idx * 0.5)
    inv_dim_t = jnp.exp((-2.0 * log_temp / num_feats) * half)   # 1 / dim_t[f]
    phase = (f_idx - 2.0 * half) * (0.5 * math.pi)              # 0 (even) or pi/2 (odd)
    # one VPU fma-ish path + one sin per output element; broadcast over batch & L
    out_ref[...] = jnp.sin(x_ref[...] * inv_dim_t + phase)


def _pick_f_tile(F, L_pad, bytes_budget):
    """Divisor of F, multiple of 8 (or F itself), largest fitting the budget."""
    cands = [d for d in range(8, F + 1, 8) if F % d == 0]
    if F not in cands:
        cands.append(F)
    cands.sort()
    fit = [d for d in cands if d * L_pad * 4 <= bytes_budget]
    return fit[-1] if fit else cands[0]


def _pick_b_tile(B, per_batch_bytes, bytes_budget):
    """Largest divisor of B whose block still fits the budget."""
    best = 1
    for d in range(1, B + 1):
        if B % d == 0 and d * per_batch_bytes <= bytes_budget:
            best = d
    return best


def position_embedding_caption_sine(mask, *, num_pos_feats, temperature=10000,
                                    normalize=False, scale=None):
    """mask: (B, L) bool/int (True/1 = padding). Returns (B, num_pos_feats, L) f32."""
    if scale is not None and normalize is False:
        raise ValueError("normalize should be True if scale is passed")
    if scale is None:
        scale = 2 * math.pi
    assert num_pos_feats % 2 == 0, "num_pos_feats must be even (stack/flatten in reference)"

    B, L = mask.shape
    F = num_pos_feats

    # ---- tiny wrapper-side precompute (O(B*L) work) ---------------------------
    not_mask = 1.0 - mask.astype(jnp.float32)
    x_embed = jnp.cumsum(not_mask, axis=1)                        # (B, L) f32
    if normalize:
        eps = 1e-6
        x_embed = (x_embed - 0.5) / (x_embed[:, -1:] + eps) * scale

    # Lane-dense output: pad L up to a multiple of 128 (slice result afterwards).
    L_pad = ((L + 127) // 128) * 128
    if L_pad != L:
        x_embed = jnp.pad(x_embed, ((0, 0), (0, L_pad - L)))
    x_embed = x_embed.reshape(B, 1, L_pad)

    # ---- tile selection (exact divisors, ~4 MiB output blocks) ---------------
    bytes_budget = 4 << 20
    f_tile = _pick_f_tile(F, L_pad, bytes_budget)
    b_tile = _pick_b_tile(B, f_tile * L_pad * 4, bytes_budget)

    # Keep >=2 grid steps on big problems so both v7x TensorCores get work.
    if (B // b_tile) * (F // f_tile) == 1 and B * F * L_pad * 4 >= (1 << 20):
        smaller_f = [d for d in range(8, f_tile, 8) if F % d == 0]
        if smaller_f:
            f_tile = smaller_f[-1]
        elif b_tile > 1 and b_tile % 2 == 0:
            b_tile //= 2

    grid = (B // b_tile, F // f_tile)

    kernel = functools.partial(
        _pos_embed_kernel,
        f_tile=f_tile,
        num_feats=float(F),
        log_temp=math.log(float(temperature)),
    )

    pos = pl.pallas_call(
        kernel,
        out_shape=jax.ShapeDtypeStruct((B, F, L_pad), jnp.float32),
        grid=grid,
        in_specs=[
            pl.BlockSpec((b_tile, 1, L_pad), lambda b, f: (b, 0, 0)),   # x_embed
        ],
        out_specs=pl.BlockSpec((b_tile, f_tile, L_pad), lambda b, f: (b, f, 0)),
        compiler_params=pltpu.CompilerParams(
            dimension_semantics=("parallel", "parallel"),
            vmem_limit_bytes=32 << 20,
        ),
    )(x_embed)

    if L_pad != L:
        pos = pos[:, :, :L]
    return pos


def _reference(mask, *, num_pos_feats, temperature=10000, normalize=False, scale=None):
    """Pure-JAX reference mirroring the PyTorch forward, for verification."""
    if scale is None:
        scale = 2 * math.pi
    not_mask = ~mask.astype(bool)
    x_embed = jnp.cumsum(not_mask.astype(jnp.float32), axis=1)
    if normalize:
        eps = 1e-6
        x_embed = (x_embed - 0.5) / (x_embed[:, -1:] + eps) * scale
    dim_t = jnp.arange(num_pos_feats, dtype=jnp.float32)
    dim_t = temperature ** (2 * jnp.floor(dim_t / 2) / num_pos_feats)
    pos_x = x_embed[:, :, None] / dim_t
    pos_x = jnp.stack((jnp.sin(pos_x[:, :, 0::2]), jnp.cos(pos_x[:, :, 1::2])), axis=3)
    pos_x = pos_x.reshape(pos_x.shape[0], pos_x.shape[1], -1)
    return jnp.transpose(pos_x, (0, 2, 1))


if __name__ == "__main__":
    key = jax.random.PRNGKey(0)

    # Primary small case (mirrors the torch module usage): B=2, L=16, F=32.
    B, L, NUM_POS_FEATS = 2, 16, 32
    kx, km, km2 = jax.random.split(key, 3)
    # tensor_list.tensors (only used for device placement in the torch module)
    x = jax.random.normal(kx, (B, 4, L), dtype=jnp.float32)
    # tensor_list.mask: True = padding
    mask = jax.random.uniform(km, (B, L)) > 0.7

    pos = position_embedding_caption_sine(
        mask, num_pos_feats=NUM_POS_FEATS, temperature=10000,
        normalize=True, scale=2 * math.pi,
    )
    pos = jax.block_until_ready(pos)
    ref = _reference(mask, num_pos_feats=NUM_POS_FEATS, temperature=10000,
                     normalize=True, scale=2 * math.pi)
    assert pos.shape == (B, NUM_POS_FEATS, L), pos.shape
    assert jnp.allclose(pos, ref, atol=1e-5, rtol=1e-5), "mismatch vs reference (case 1)"

    # Second case exercising L padding (130 -> 256) and a bigger feature dim.
    B2, L2, F2 = 4, 130, 64
    mask2 = jax.random.uniform(km2, (B2, L2)) > 0.5
    pos2 = position_embedding_caption_sine(
        mask2, num_pos_feats=F2, temperature=10000, normalize=True,
    )
    pos2 = jax.block_until_ready(pos2)
    ref2 = _reference(mask2, num_pos_feats=F2, temperature=10000, normalize=True)
    assert pos2.shape == (B2, F2, L2), pos2.shape
    assert jnp.allclose(pos2, ref2, atol=1e-5, rtol=1e-5), "mismatch vs reference (case 2)"

    print("KERNEL_OK")
</pallas_src>

<mosaic_0001>
module attributes {stable_mosaic.version = 11 : i64} {
  func.func @_pos_embed_kernel(%arg0: i32, %arg1: i32, %arg2: memref<2x1x128xf32, #tpu.memory_space<vmem>>, %arg3: memref<2x32x128xf32, #tpu.memory_space<vmem>>) attributes {dimension_semantics = [#tpu.dimension_semantics<parallel>, #tpu.dimension_semantics<parallel>], iteration_bounds = array<i64: 1, 1>, scalar_prefetch = 0 : i64, scratch_operands = 0 : i64, tpu.core_type = #tpu.core_type<tc>, window_params = [{transform_indices = @transform_0, window_bounds = array<i64: 2, 1, 128>}, {transform_indices = @transform_1, window_bounds = array<i64: 2, 32, 128>}]} {
    %c32_i32 = arith.constant 32 : i32
    %0 = arith.muli %arg1, %c32_i32 : i32
    %1 = arith.sitofp %0 : i32 to f32
    %2 = tpu.iota {dimensions = array<i32: 1>} : vector<1x32x1xi32>
    %3 = arith.sitofp %2 : vector<1x32x1xi32> to vector<1x32x1xf32>
    %4 = vector.broadcast %1 : f32 to vector<1x32x1xf32>
    %5 = arith.addf %3, %4 : vector<1x32x1xf32>
    %cst = arith.constant 5.000000e-01 : f32
    %6 = vector.broadcast %cst : f32 to vector<1x32x1xf32>
    %7 = arith.mulf %5, %6 : vector<1x32x1xf32>
    %8 = math.floor %7 : vector<1x32x1xf32>
    %cst_0 = arith.constant -0.575646281 : f32
    %9 = vector.broadcast %cst_0 : f32 to vector<1x32x1xf32>
    %10 = arith.mulf %9, %8 : vector<1x32x1xf32>
    %11 = math.exp %10 : vector<1x32x1xf32>
    %cst_1 = arith.constant 2.000000e+00 : f32
    %12 = vector.broadcast %cst_1 : f32 to vector<1x32x1xf32>
    %13 = arith.mulf %12, %8 : vector<1x32x1xf32>
    %14 = arith.subf %5, %13 : vector<1x32x1xf32>
    %cst_2 = arith.constant 1.57079637 : f32
    %15 = vector.broadcast %cst_2 : f32 to vector<1x32x1xf32>
    %16 = arith.mulf %14, %15 : vector<1x32x1xf32>
    %c0 = arith.constant 0 : index
    %c0_3 = arith.constant 0 : index
    %c0_4 = arith.constant 0 : index
    %17 = vector.load %arg2[%c0, %c0_3, %c0_4] : memref<2x1x128xf32, #tpu.memory_space<vmem>>, vector<2x1x128xf32>
    %18 = vector.broadcast %17 : vector<2x1x128xf32> to vector<2x32x128xf32>
    %19 = vector.broadcast %11 : vector<1x32x1xf32> to vector<2x32x128xf32>
    %20 = arith.mulf %18, %19 : vector<2x32x128xf32>
    %21 = vector.broadcast %16 : vector<1x32x1xf32> to vector<2x32x128xf32>
    %22 = arith.addf %20, %21 : vector<2x32x128xf32>
    %23 = math.sin %22 : vector<2x32x128xf32>
    %c0_5 = arith.constant 0 : index
    %c0_6 = arith.constant 0 : index
    %c0_7 = arith.constant 0 : index
    %24 = vector.load %arg3[%c0_5, %c0_6, %c0_7] : memref<2x32x128xf32, #tpu.memory_space<vmem>>, vector<2x32x128xf32>
    tpu.vector_store %arg3[%c0_5, %c0_6, %c0_7], %23 {strides = array<i32>} : memref<2x32x128xf32, #tpu.memory_space<vmem>>, vector<2x32x128xf32>,
    return
  }
  func.func @transform_0(%arg0: i32, %arg1: i32) -> (i32, i32, i32) {
    %c0_i32 = arith.constant 0 : i32
    %c0_i32_0 = arith.constant 0 : i32
    %c0_i32_1 = arith.constant 0 : i32
    return %arg0, %c0_i32, %c0_i32_0 : i32, i32, i32
  }
  func.func @transform_1(%arg0: i32, %arg1: i32) -> (i32, i32, i32) {
    %c0_i32 = arith.constant 0 : i32
    %c0_i32_0 = arith.constant 0 : i32
    return %arg0, %arg1, %c0_i32 : i32, i32, i32
  }
}

</mosaic_0001>

<bundles_post_ra>
// kernel: tpu_custom_call.1
= control target key start
LH: loop header
LB: loop body
LE: loop exit
PB: predicated region body
PF: predicated region fallthrough
CT: control target
= control target key end

     0   :  { %6 = vsyncpa [#allocation3], 0  ;;  %s1729_s0 = inlined_call_operand.hbm [shape: f32[2,1,128], index: 0, kind: input, shape index: {}]   ;;  %s1730_s1 = inlined_call_operand.hbm [shape: f32[2,32,128], index: 1, kind: output, shape index: {}]  }
   0x1   :  { %7 = vsyncpa [#allocation4], 0  ;;  %s1124_s6 = smov [#allocation2]   ;;  %s1076_s10 = scalar_lea.hbm %s1729_s0, 32 }
   0x2   :  { %s13_s7 = sshll.u32 %s1124_s6, 4  ;;  %p1077_p0 = scmp.ne.s32.totalorder %s1729_s0, %s1076_s10  ;;  %s14_s7 = int_to_ptr.vmem [resolvable:$true] %s13_s7 }
   0x3   :  { %p1080_p1 = scmp.lt.u32.totalorder %s1076_s10, %s1729_s0 }
   0x5   :  { %p1082_p2 = pnand %p1080_p1, %p1077_p0 }
   0x7   :  { %1085 = shalt.err (!%p1082_p2)
}
   0x8   :  { %s1086_s15 = scalar_lea.vmem %s14_s7, 32  ;;  %p1091_p4 = scmp.lt.s32.totalorder %s14_s7, %s14_s7 }
   0x9   :  { %p1087_p3 = scmp.ne.s32.totalorder %s14_s7, %s1086_s15  ;;  %p1092_p5 = scmp.lt.s32.totalorder %s1086_s15, %s1086_s15 }
   0xb   :  { %p1093_p6 = por %p1092_p5, %p1091_p4 }
   0xd   :  { %p1094_p7 = pnand %p1093_p6, %p1087_p3 }
   0xf   :  { %1097 = shalt.err (!%p1094_p7)
}
  0x10   :  { %s1125_s16 = smov 16   ;;  %s1126_s17 = smov 1  }
  0x11   :  { %19 = dma.hbm_to_vmem [thread:$0]  %s1729_s0, 32, %s14_s7, [#allocation3], %s1125_s16, %s1125_s16, %s1126_s17  }
  0x12   :  { %1120 = dma.done.wait [#allocation3], 32  }
  0x13   :  { %1121 = vsyncadd [#allocation3], 4294967264  ;;  %v25_v0 = vlaneseq  ;;  %v958_v33 = vld [vmem:[#allocation2] ss:$0 sm:$0xff]  ;;  %v959_v34 = vld [vmem:[#allocation2 + $0x1] ss:$0 sm:$0xff] }
  0x14   :  { %s1133_s0 = smov [#allocation5]  }
  0x15   :  { %v26_v1 = vshrl.u32 %v25_v0, 7  ;;  %s946_s20 = sshll.u32 %s1133_s0, 4  ;;  %s947_s20 = int_to_ptr.vmem [resolvable:$true] %s946_s20 }
  0x16   :  { %s1098_s21 = scalar_lea.vmem %s947_s20, 1024  ;;  %p1103_p9 = scmp.lt.s32.totalorder %s947_s20, %s947_s20 }
  0x17   :  { %v27_v2 = vadd.s32 8, %v26_v1  ;;  %v28_v3 = vadd.s32 16, %v26_v1  ;;  %v29_v4 = vadd.s32 24, %v26_v1  ;;  %v30_v5 = vcvt.s32.f32 %v26_v1  ;;  %p1099_p8 = scmp.ne.s32.totalorder %s947_s20, %s1098_s21  ;;  %p1104_p10 = scmp.lt.s32.totalorder %s1098_s21, %s1098_s21 }
  0x19   :  { %v31_v6 = vcvt.s32.f32 %v27_v2  ;;  %v32_v7 = vcvt.s32.f32 %v28_v3  ;;  %v33_v8 = vcvt.s32.f32 %v29_v4  ;;  %v39_v9 = vmul.f32 0.5, %v30_v5  ;;  %p1105_p11 = por %p1104_p10, %p1103_p9 }
  0x1b   :  { %v40_v10 = vmul.f32 0.5, %v31_v6  ;;  %v41_v11 = vmul.f32 0.5, %v32_v7  ;;  %v42_v12 = vmul.f32 0.5, %v33_v8  ;;  %v43_v13 = vfloor.f32 %v39_v9  ;;  %p1106_p12 = pnand %p1105_p11, %p1099_p8 }
  0x1d   :  { %v44_v14 = vfloor.f32 %v40_v10  ;;  %v45_v15 = vfloor.f32 %v41_v11  ;;  %v46_v16 = vfloor.f32 %v42_v12  ;;  %v47_v17 = vmul.f32 -0.5756463, %v43_v13 }
  0x1e   :  { %v59_v25 = vmul.f32 2.0, %v43_v13 }
  0x1f   :  { %v48_v18 = vmul.f32 -0.5756463, %v44_v14  ;;  %v49_v19 = vmul.f32 -0.5756463, %v45_v15  ;;  %v50_v20 = vmul.f32 -0.5756463, %v46_v16 }
  0x20   :  { %v51_v21 = vmul.f32 1.442695, %v47_v17  ;;  %v60_v26 = vmul.f32 2.0, %v44_v14  ;;  %v61_v27 = vmul.f32 2.0, %v45_v15  ;;  %v62_v28 = vmul.f32 2.0, %v46_v16 }
  0x21   :  { %v53_v22 = vmul.f32 1.442695, %v48_v18  ;;  %v55_v23 = vmul.f32 1.442695, %v49_v19  ;;  %v57_v24 = vmul.f32 1.442695, %v50_v20  ;;  %v63_v29 = vsub.f32 %v30_v5, %v59_v25 }
  0x22   :  { %1036 = vpow2.f32 %v51_v21  ;;  %v64_v30 = vsub.f32 %v31_v6, %v60_v26  ;;  %v65_v31 = vsub.f32 %v32_v7, %v61_v27  ;;  %v66_v32 = vsub.f32 %v33_v8, %v62_v28 }
  0x23   :  { %1038 = vpow2.f32 %v53_v22  ;;  %v67_v35 = vmul.f32 1.5707964, %v63_v29  ;;  %v1127_v20 = vmov 683565275   ;;  %v1128_v22 = vmov 2475754826  }
  0x24   :  { %1040 = vpow2.f32 %v55_v23  ;;  %v68_v37 = vmul.f32 1.5707964, %v64_v30  ;;  %v69_v39 = vmul.f32 1.5707964, %v65_v31  ;;  %v70_v43 = vmul.f32 1.5707964, %v66_v32 }
  0x25   :  { %1042 = vpow2.f32 %v57_v24  ;;  %v1129_v24 = vmov 2131351028   ;;  %v1130_v26 = vmov 2102212464   ;;  %v1131_v28 = vmov 920167782  }
  0x2c   :  { %v1037_v36 = vpop.eup %1036 }
  0x2d   :  { %v1039_v38 = vpop.eup %1038  ;;  %v85_v40 = vmul.f32 %v1037_v36, %v958_v33  ;;  %v89_v41 = vmul.f32 %v1037_v36, %v959_v34  ;;  %v1132_v36 = vmov 1326507024  }
  0x2e   :  { %v1041_v42 = vpop.eup %1040  ;;  %v86_v44 = vmul.f32 %v1039_v38, %v958_v33  ;;  %v90_v45 = vmul.f32 %v1039_v38, %v959_v34 }
  0x2f   :  { %v1043_v46 = vpop.eup %1042  ;;  %v87_v47 = vmul.f32 %v1041_v42, %v958_v33  ;;  %v91_v48 = vmul.f32 %v1041_v42, %v959_v34  ;;  %v1158_v49 = vadd.f32 %v85_v40, %v67_v35  ;;  %v1160_v50 = vadd.f32 %v89_v41, %v67_v35 }
  0x30   :  { %v92_v51 = vmul.f32 %v1043_v46, %v959_v34  ;;  %v1162_v52 = vadd.f32 %v86_v44, %v68_v37  ;;  %v1164_v53 = vadd.f32 %v90_v45, %v68_v37  ;;  %v88_v3 = vmul.f32 %v1043_v46, %v958_v33 }
  0x31   :  { %v1166_v54 = vadd.f32 %v91_v48, %v69_v39  ;;  %v101_v55 = vand.u32 2147483647, %v1158_v49  ;;  %v1169_v56 = vadd.f32 %v87_v47, %v69_v39  ;;  %v104_v58 = vand.u32 2139095040, %v1158_v49 }
  0x32   :  { %v1171_v57 = vadd.f32 %v92_v51, %v70_v43  ;;  %v205_v59 = vand.u32 2147483647, %v1162_v52  ;;  %v208_v61 = vand.u32 2139095040, %v1162_v52  ;;  %v1181_v12 = vadd.f32 %v88_v3, %v70_v43 }
  0x33   :  { %v105_v60 = vshrl.u32 %v104_v58, 23  ;;  %v108_v62 = vand.u32 8388607, %v101_v55  ;;  %v312_v2 = vand.u32 2139095040, %v1169_v56  ;;  %v309_v17 = vand.u32 2147483647, %v1169_v56 }
  0x34   :  { %v212_v63 = vand.u32 8388607, %v205_v59  ;;  %v209_v1 = vshrl.u32 %v208_v61, 23  ;;  %vm103_vm13 = vcmp.lt.s32.totalorder %v1158_v49, 0  ;;  %vm1289_vm15 = vcmp.le.f32.partialorder %v101_v55, 0.7853982 }
  0x35   :  { %v960_v0 = vadd.s32 4294967169, %v105_v60  ;;  %v313_v6 = vshrl.u32 %v312_v2, 23  ;;  %v109_v7 = vor.u32 8388608, %v108_v62 }
  0x36   :  { %v964_v5 = vadd.s32 4294967169, %v209_v1  ;;  %v213_v8 = vor.u32 8388608, %v212_v63 }
  0x37   :  { %v111_v4 = vadd.s32 1, %v960_v0  ;;  %v968_v10 = vadd.s32 4294967169, %v313_v6  ;;  %v1183_v15 = vshll.u32 %v109_v7, 8 }
  0x38   :  { %v215_v9 = vadd.s32 1, %v964_v5  ;;  %v1185_v16 = vshll.u32 %v213_v8, 8 }
  0x39   :  { %vm112_vm0 = vcmp.gt.s32.totalorder %v111_v4, 0  ;;  %v1188_v18 = vadd.s32 1, %v968_v10 }
  0x3a   :  { %v113_v11 = vsel %vm112_vm0, %v111_v4, 0  ;;  %vm216_vm1 = vcmp.gt.s32.totalorder %v215_v9, 0 }
  0x3b   :  { %v114_v13 = vshrl.u32 %v113_v11, 5  ;;  %v115_v14 = vand.u32 31, %v113_v11  ;;  %v217_v30 = vsel %vm216_vm1, %v215_v9, 0  ;;  %vm320_vm8 = vcmp.gt.s32.totalorder %v1188_v18, 0 }
  0x3c   :  { %v218_v43 = vshrl.u32 %v217_v30, 5  ;;  %v219_v44 = vand.u32 31, %v217_v30 }
  0x3d   :  { %v116_v19 = vsub.s32 32, %v115_v14  ;;  %v118_v21 = vshll.u32 %v1127_v20, %v115_v14  ;;  %v121_v23 = vshll.u32 %v1128_v22, %v115_v14  ;;  %v124_v25 = vshll.u32 %v1129_v24, %v115_v14 }
  0x3e   :  { %v127_v27 = vshll.u32 %v1130_v26, %v115_v14  ;;  %v130_v29 = vshll.u32 %v1131_v28, %v115_v14  ;;  %vm133_vm2 = vcmp.lt.s32.totalorder %v114_v13, 1  ;;  %vm134_vm3 = vcmp.lt.s32.totalorder %v114_v13, 2 }
  0x3f   :  { %v117_v31 = vshrl.u32 %v1127_v20, %v116_v19  ;;  %v119_v32 = vshrl.u32 %v1128_v22, %v116_v19  ;;  %v122_v33 = vshrl.u32 %v1129_v24, %v116_v19  ;;  %v125_v34 = vshrl.u32 %v1130_v26, %v116_v19 }
  0x40   :  { %v128_v35 = vshrl.u32 %v1131_v28, %v116_v19  ;;  %v131_v37 = vshrl.u32 %v1132_v36, %v116_v19  ;;  %vm135_vm4 = vcmp.lt.s32.totalorder %v114_v13, 3  ;;  %vm136_vm5 = vcmp.lt.s32.totalorder %v114_v13, 4 }
  0x41   :  { %v120_v38 = vor.u32 %v119_v32, %v118_v21  ;;  %v123_v39 = vor.u32 %v122_v33, %v121_v23  ;;  %v126_v40 = vor.u32 %v125_v34, %v124_v25  ;;  %v220_v61 = vsub.s32 32, %v219_v44 }
  0x42   :  { %v129_v41 = vor.u32 %v128_v35, %v127_v27  ;;  %v132_v42 = vor.u32 %v131_v37, %v130_v29  ;;  %v222_v1 = vshll.u32 %v1127_v20, %v219_v44  ;;  %v225_v11 = vshll.u32 %v1128_v22, %v219_v44 }
  0x43   :  { %v137_v45 = vsel %vm133_vm2, %v117_v31, %v120_v38  ;;  %v138_v46 = vsel %vm136_vm5, %v126_v40, 2102212464  ;;  %v141_v47 = vsel %vm133_vm2, %v120_v38, %v123_v39  ;;  %v145_v48 = vsel %vm133_vm2, %v123_v39, %v126_v40 }
  0x44   :  { %v139_v51 = vsel %vm135_vm4, %v123_v39, %v138_v46  ;;  %v142_v58 = vsel %vm136_vm5, %v129_v41, 920167782  ;;  %v146_v60 = vsel %vm136_vm5, %v132_v42, 1326507024  ;;  %v221_v5 = vshrl.u32 %v1127_v20, %v220_v61 }
  0x45   :  { %v140_v62 = vsel %vm134_vm3, %v137_v45, %v139_v51  ;;  %v143_v63 = vsel %vm135_vm4, %v126_v40, %v142_v58  ;;  %v147_v0 = vsel %vm135_vm4, %v129_v41, %v146_v60  ;;  %v223_v10 = vshrl.u32 %v1128_v22, %v220_v61 }
  0x46   :  { %v144_v2 = vsel %vm134_vm3, %v141_v47, %v143_v63  ;;  %v148_v3 = vsel %vm134_vm3, %v145_v48, %v147_v0  ;;  %v156_v4 = vmul.u32 %v1183_v15, %v140_v62  ;;  %v226_v13 = vshrl.u32 %v1129_v24, %v220_v61 }
  0x47   :  { %v1215_v6 = vmul.u32.u64.low %v1183_v15, %v148_v3  ;;  %v1216_v7 = vmul.u32.u64.high %v1183_v15, %v148_v3, %v1215_v6  ;;  %v1219_v8 = vmul.u32.u64.low %v1183_v15, %v144_v2  ;;  %v1220_v9 = vmul.u32.u64.high %v1183_v15, %v144_v2, %v1219_v8 }
  0x48   :  { %v228_v14 = vshll.u32 %v1129_v24, %v219_v44  ;;  %v229_v19 = vshrl.u32 %v1130_v26, %v220_v61  ;;  %v231_v21 = vshll.u32 %v1130_v26, %v219_v44  ;;  %v232_v23 = vshrl.u32 %v1131_v28, %v220_v61 }
  0x49   :  { %v234_v25 = vshll.u32 %v1131_v28, %v219_v44  ;;  %v224_v27 = vor.u32 %v223_v10, %v222_v1  ;;  %v227_v15 = vor.u32 %v226_v13, %v225_v11  ;;  %v235_v29 = vshrl.u32 %v1132_v36, %v220_v61 }
  0x4a   :  { %vm237_vm6 = vcmp.lt.s32.totalorder %v218_v43, 1  ;;  %vm158_vm7 = vc.u32 %v1216_v7, %v1219_v8  ;;  %v159_v30 = vadd.s32 1, %v1220_v9  ;;  %v230_v31 = vor.u32 %v229_v19, %v228_v14 }
  0x4b   :  { %v233_v32 = vor.u32 %v232_v23, %v231_v21  ;;  %v236_v33 = vor.u32 %v235_v29, %v234_v25  ;;  %vm238_vm9 = vcmp.lt.s32.totalorder %v218_v43, 2  ;;  %vm239_vm10 = vcmp.lt.s32.totalorder %v218_v43, 3 }
  0x4c   :  { %v160_v34 = vsel %vm158_vm7, %v159_v30, %v1220_v9  ;;  %vm240_vm11 = vcmp.lt.s32.totalorder %v218_v43, 4  ;;  %v241_v35 = vsel %vm237_vm6, %v221_v5, %v224_v27  ;;  %v245_v37 = vsel %vm237_vm6, %v224_v27, %v227_v15 }
  0x4d   :  { %v161_v38 = vadd.s32 %v160_v34, %v156_v4  ;;  %v242_v39 = vsel %vm240_vm11, %v230_v31, 2102212464  ;;  %v246_v40 = vsel %vm240_vm11, %v233_v32, 920167782  ;;  %v249_v41 = vsel %vm237_vm6, %v227_v15, %v230_v31 }
  0x4e   :  { %v243_v42 = vsel %vm239_vm10, %v227_v15, %v242_v39  ;;  %v247_v44 = vsel %vm239_vm10, %v230_v31, %v246_v40  ;;  %v250_v45 = vsel %vm240_vm11, %v236_v33, 1326507024  ;;  %v316_v46 = vand.u32 8388607, %v309_v17 }
  0x4f   :  { %v162_v47 = vadd.s32 536870912, %v161_v38  ;;  %v248_v48 = vsel %vm238_vm9, %v245_v37, %v247_v44  ;;  %v251_v51 = vsel %vm239_vm10, %v233_v32, %v250_v45  ;;  %v321_v58 = vsel %vm320_vm8, %v1188_v18, 0 }
  0x50   :  { %v244_v60 = vsel %vm238_vm9, %v241_v35, %v243_v42  ;;  %v252_v61 = vsel %vm238_vm9, %v249_v41, %v251_v51  ;;  %v1249_v62 = vmul.u32.u64.low %v1185_v16, %v248_v48  ;;  %v1250_v63 = vmul.u32.u64.high %v1185_v16, %v248_v48, %v1249_v62 }
  0x51   :  { %v163_v0 = vshrl.u32 %v162_v47, 30  ;;  %v1254_v1 = vmul.u32.u64.low %v1185_v16, %v252_v61  ;;  %v1255_v2 = vmul.u32.u64.high %v1185_v16, %v252_v61, %v1254_v1  ;;  %v416_v3 = vand.u32 2139095040, %v1181_v12 }
  0x52   :  { %v317_v4 = vor.u32 8388608, %v316_v46  ;;  %v323_v5 = vand.u32 31, %v321_v58  ;;  %v260_v18 = vmul.u32 %v1185_v16, %v244_v60  ;;  %v263_v43 = vadd.s32 1, %v1250_v63 }
  0x53   :  { %v164_v6 = vshll.u32 %v163_v0, 30  ;;  %vm262_vm12 = vc.u32 %v1255_v2, %v1249_v62  ;;  %v413_v11 = vand.u32 2147483647, %v1181_v12  ;;  %v417_v13 = vshrl.u32 %v416_v3, 23 }
  0x54   :  { %v324_v9 = vsub.s32 32, %v323_v5  ;;  %v264_v14 = vsel %vm262_vm12, %v263_v43, %v1250_v63  ;;  %v326_v19 = vshll.u32 %v1127_v20, %v323_v5  ;;  %v329_v21 = vshll.u32 %v1128_v22, %v323_v5 }
  0x55   :  { %v1260_v10 = vsub.s32 %v161_v38, %v164_v6  ;;  %v1269_v16 = vshll.u32 %v317_v4, 8  ;;  %v265_v25 = vadd.s32 %v264_v14, %v260_v18  ;;  %v322_v29 = vshrl.u32 %v321_v58, 5 }
  0x56   :  { %v327_v27 = vshrl.u32 %v1128_v22, %v324_v9  ;;  %v330_v15 = vshrl.u32 %v1129_v24, %v324_v9  ;;  %v332_v30 = vshll.u32 %v1129_v24, %v323_v5  ;;  %v333_v31 = vshrl.u32 %v1130_v26, %v324_v9 }
  0x57   :  { %v167_v23 = vsub.s32 0, %v1260_v10  ;;  %v335_v32 = vshll.u32 %v1130_v26, %v323_v5  ;;  %v266_v34 = vadd.s32 536870912, %v265_v25  ;;  %v972_v35 = vadd.s32 4294967169, %v417_v13 }
  0x58   :  { %v1280_v37 = vand.u32 8388607, %v413_v11  ;;  %v157_v38 = vadd.s32 %v1219_v8, %v1216_v7  ;;  %v336_v39 = vshrl.u32 %v1131_v28, %v324_v9  ;;  %v338_v40 = vshll.u32 %v1131_v28, %v323_v5 }
  0x59   :  { %v961_v33 = vmin.u32 %v167_v23, %v1260_v10  ;;  %v339_v41 = vshrl.u32 %v1132_v36, %v324_v9  ;;  %v187_v44 = vsub.s32 4, %v163_v0  ;;  %v328_v45 = vor.u32 %v327_v27, %v326_v19 }
  0x5a   :  { %v331_v46 = vor.u32 %v330_v15, %v329_v21  ;;  %v267_v47 = vshrl.u32 %v266_v34, 30  ;;  %v334_v48 = vor.u32 %v333_v31, %v332_v30  ;;  %v337_v51 = vor.u32 %v336_v39, %v335_v32 }
  0x5b   :  { %v169_v42 = vclz %v961_v33  ;;  %vm341_vm14 = vcmp.lt.s32.totalorder %v322_v29, 1  ;;  %vm343_vm0 = vcmp.lt.s32.totalorder %v322_v29, 3  ;;  %vm344_vm1 = vcmp.lt.s32.totalorder %v322_v29, 4 }
  0x5c   :  { %v423_v8 = vadd.s32 1, %v972_v35  ;;  %v268_v60 = vshll.u32 %v267_v47, 30  ;;  %v325_v61 = vshrl.u32 %v1127_v20, %v324_v9  ;;  %v340_v63 = vor.u32 %v339_v41, %v338_v40 }
  0x5d   :  { %v962_v7 = vadd.s32 4294967294, %v169_v42  ;;  %v350_v1 = vsel %vm344_vm1, %v337_v51, 920167782  ;;  %v188_v3 = vsel %vm103_vm13, %v187_v44, %v163_v0  ;;  %vm342_vm3 = vcmp.lt.s32.totalorder %v322_v29, 2 }
  0x5e   :  { %v349_v55 = vsel %vm341_vm14, %v328_v45, %v331_v46  ;;  %v1298_v5 = vsub.s32 %v265_v25, %v268_v60  ;;  %v346_v6 = vsel %vm344_vm1, %v334_v48, 2102212464  ;;  %v351_v18 = vsel %vm343_vm0, %v334_v48, %v350_v1 }
  0x5f   :  { %vm963_vm2 = vcmp.lt.s32.totalorder %v962_v7, 0  ;;  %v353_v14 = vsel %vm341_vm14, %v331_v46, %v334_v48  ;;  %v291_v21 = vsub.s32 4, %v267_v47  ;;  %v345_v0 = vsel %vm341_vm14, %v325_v61, %v328_v45 }
  0x60   :  { %v172_v4 = vsel %vm963_vm2, 0, %v962_v7  ;;  %v271_v19 = vsub.s32 0, %v1298_v5  ;;  %v354_v23 = vsel %vm344_vm1, %v340_v63, 1326507024  ;;  %v347_v15 = vsel %vm343_vm0, %v331_v46, %v346_v6 }
  0x61   :  { %v173_v43 = vsub.s32 32, %v172_v4  ;;  %v174_v9 = vshll.u32 %v1260_v10, %v172_v4  ;;  %v177_v13 = vsub.s32 4294967266, %v172_v4  ;;  %v355_v30 = vsel %vm343_vm0, %v337_v51, %v354_v23 }
  0x62   :  { %v965_v31 = vmin.u32 %v271_v19, %v1298_v5  ;;  %v352_v10 = vsel %vm342_vm3, %v349_v55, %v351_v18  ;;  %v356_v32 = vsel %vm342_vm3, %v353_v14, %v355_v30  ;;  %vm424_vm4 = vcmp.gt.s32.totalorder %v423_v8, 0 }
  0x63   :  { %v175_v27 = vshrl.u32 %v157_v38, %v173_v43  ;;  %v178_v25 = vadd.s32 127, %v177_v13  ;;  %v1313_v35 = vmul.u32.u64.low %v1269_v16, %v356_v32  ;;  %v1314_v39 = vmul.u32.u64.high %v1269_v16, %v356_v32, %v1313_v35 }
  0x64   :  { %v190_v38 = vsel %vm1289_vm15, 0, %v188_v3  ;;  %v273_v40 = vclz %v965_v31  ;;  %v348_v41 = vsel %vm342_vm3, %v345_v0, %v347_v15  ;;  %v421_v42 = vor.u32 8388608, %v1280_v37 }
  0x65   :  { %v176_v33 = vor.u32 %v175_v27, %v174_v9  ;;  %v179_v34 = vshll.u32 %v178_v25, 23  ;;  %v1321_v46 = vmul.u32.u64.low %v1269_v16, %v352_v10  ;;  %v1322_v48 = vmul.u32.u64.high %v1269_v16, %v352_v10, %v1321_v46 }
  0x66   :  { %vm1327_vm5 = vcmp.le.f32.partialorder %v205_v59, 0.7853982  ;;  %vm207_vm6 = vcmp.lt.s32.totalorder %v1162_v52, 0  ;;  %v966_v7 = vadd.s32 4294967294, %v273_v40  ;;  %v425_v29 = vsel %vm424_vm4, %v423_v8, 0 }
  0x67   :  { %v180_v44 = vor.u32 4788187, %v179_v34  ;;  %v183_v45 = vcvt.s32.f32 %v176_v33  ;;  %v194_v61 = vadd.s32 3, %v190_v38  ;;  %v261_v37 = vadd.s32 %v1249_v62, %v1255_v2 }
  0x68   :  { %v292_v63 = vsel %vm207_vm6, %v291_v21, %v267_v47  ;;  %vm967_vm7 = vcmp.lt.s32.totalorder %v966_v7, 0  ;;  %v364_v1 = vmul.u32 %v1269_v16, %v348_v41  ;;  %vm366_vm8 = vc.u32 %v1314_v39, %v1321_v46 }
  0x69   :  { %v181_v60 = vand.u32 2147483647, %v180_v44  ;;  %v427_v59 = vand.u32 31, %v425_v29  ;;  %v276_v55 = vsel %vm967_vm7, 0, %v966_v7  ;;  %v367_v4 = vadd.s32 1, %v1322_v48 }
  0x6a   :  { %v1340_v8 = vshll.u32 %v421_v42, 8  ;;  %v277_v6 = vsub.s32 32, %v276_v55  ;;  %v278_v18 = vshll.u32 %v1298_v5, %v276_v55  ;;  %v281_v62 = vsub.s32 4294967266, %v276_v55 }
  0x6b   :  { %v184_v3 = vmul.f32 %v183_v45, %v181_v60  ;;  %v428_v2 = vsub.s32 32, %v427_v59  ;;  %v1343_v47 = vand.u32 3, %v194_v61  ;;  %v294_v16 = vsel %vm1327_vm5, 0, %v292_v63 }
  0x6c   :  { %v368_v9 = vsel %vm366_vm8, %v367_v4, %v1322_v48  ;;  %v279_v13 = vshrl.u32 %v261_v37, %v277_v6  ;;  %v282_v14 = vadd.s32 127, %v281_v62  ;;  %v1348_v21 = vshrl.u32 %v425_v29, 5 }
  0x6d   :  { %v185_v43 = vxor.u32 2147483648, %v184_v3  ;;  %v369_v19 = vadd.s32 %v368_v9, %v364_v1  ;;  %v430_v5 = vshll.u32 %v1127_v20, %v427_v59  ;;  %v431_v23 = vshrl.u32 %v1128_v22, %v428_v2 }
  0x6e   :  { %v433_v27 = vshll.u32 %v1128_v22, %v427_v59  ;;  %v280_v15 = vor.u32 %v279_v13, %v278_v18  ;;  %v283_v30 = vshll.u32 %v282_v14, 23  ;;  %v434_v10 = vshrl.u32 %v1129_v24, %v428_v2 }
  0x6f   :  { %v186_v0 = vsel %vm103_vm13, %v185_v43, %v184_v3  ;;  %v370_v31 = vadd.s32 536870912, %v369_v19  ;;  %v436_v32 = vshll.u32 %v1129_v24, %v427_v59  ;;  %v437_v33 = vshrl.u32 %v1130_v26, %v428_v2 }
  0x70   :  { %v189_v25 = vsel %vm1289_vm15, %v1158_v49, %v186_v0  ;;  %v284_v34 = vor.u32 4788187, %v283_v30  ;;  %v287_v35 = vcvt.s32.f32 %v280_v15  ;;  %vm200_vm9 = vcmp.eq.s32.totalorder %v1343_v47, 2 }
  0x71   :  { %1044 = vcosq.f32 %v189_v25  ;;  %v371_v38 = vshrl.u32 %v370_v31, 30  ;;  %v439_v40 = vshll.u32 %v1130_v26, %v427_v59  ;;  %v440_v58 = vshrl.u32 %v1131_v28, %v428_v2 }
  0x72   :  { %1046 = vsinq.f32 %v189_v25  ;;  %v442_v41 = vshll.u32 %v1131_v28, %v427_v59  ;;  %vm197_vm10 = vcmp.eq.s32.totalorder %v1343_v47, 0  ;;  %v285_v42 = vand.u32 2147483647, %v284_v34 }
  0x73   :  { %v298_v44 = vadd.s32 3, %v294_v16  ;;  %vm311_vm11 = vcmp.lt.s32.totalorder %v1169_v56, 0  ;;  %v372_v45 = vshll.u32 %v371_v38, 30  ;;  %v443_v48 = vshrl.u32 %v1132_v36, %v428_v2 }
  0x74   :  { %vm196_vm12 = vcmp.lt.s32.totalorder %v1343_v47, 2  ;;  %v432_v7 = vor.u32 %v431_v23, %v430_v5  ;;  %v435_v29 = vor.u32 %v434_v10, %v433_v27  ;;  %v438_v60 = vor.u32 %v437_v33, %v436_v32 }
  0x75   :  { %v441_v61 = vor.u32 %v440_v58, %v439_v40  ;;  %vm193_vm13 = vweird.f32 %v1158_v49  ;;  %v288_v37 = vmul.f32 %v287_v35, %v285_v42  ;;  %v1370_v63 = vsub.s32 %v369_v19, %v372_v45 }
  0x76   :  { %v444_v1 = vor.u32 %v443_v48, %v442_v41  ;;  %vm448_vm14 = vcmp.lt.s32.totalorder %v1348_v21, 4  ;;  %v429_v59 = vshrl.u32 %v1127_v20, %v428_v2  ;;  %vm445_vm15 = vcmp.lt.s32.totalorder %v1348_v21, 1 }
  0x77   :  { %vm447_vm0 = vcmp.lt.s32.totalorder %v1348_v21, 3  ;;  %v520_v3 = vand.u32 2139095040, %v1160_v50  ;;  %v289_v55 = vxor.u32 2147483648, %v288_v37  ;;  %v375_v4 = vsub.s32 0, %v1370_v63 }
  0x78   :  { %v395_v6 = vsub.s32 4, %v371_v38  ;;  %vm446_vm1 = vcmp.lt.s32.totalorder %v1348_v21, 2  ;;  %vm1381_vm2 = vcmp.le.f32.partialorder %v309_v17, 0.7853982  ;;  %v365_v62 = vadd.s32 %v1321_v46, %v1314_v39 }
  0x79   :  { %v450_v2 = vsel %vm448_vm14, %v438_v60, 2102212464  ;;  %v454_v43 = vsel %vm448_vm14, %v441_v61, 920167782  ;;  %v458_v16 = vsel %vm448_vm14, %v444_v1, 1326507024  ;;  %v290_v9 = vsel %vm207_vm6, %v289_v55, %v288_v37 }
  0x7a   :  { %v969_v13 = vmin.u32 %v375_v4, %v1370_v63  ;;  %v453_v14 = vsel %vm445_vm15, %v432_v7, %v435_v29  ;;  %v455_v17 = vsel %vm447_vm0, %v438_v60, %v454_v43  ;;  %v293_v0 = vsel %vm1327_vm5, %v1162_v52, %v290_v9 }
  0x7b   :  { %v1045_v19 = vpop.eup %1044  ;;  %v449_v39 = vsel %vm445_vm15, %v429_v59, %v432_v7  ;;  %v457_v46 = vsel %vm445_vm15, %v435_v29, %v438_v60  ;;  %v459_v5 = vsel %vm447_vm0, %v441_v61, %v458_v16  ;;  %1048 = vcosq.f32 %v293_v0 }
  0x7c   :  { %v1047_v23 = vpop.eup %1046  ;;  %v201_v27 = vxor.u32 2147483648, %v1045_v19  ;;  %v377_v25 = vclz %v969_v13  ;;  %v451_v15 = vsel %vm447_vm0, %v435_v29, %v450_v2  ;;  %1050 = vsinq.f32 %v293_v0 }
  0x7d   :  { %v198_v30 = vxor.u32 2147483648, %v1047_v23  ;;  %v396_v51 = vsel %vm311_vm11, %v395_v6, %v371_v38  ;;  %v456_v31 = vsel %vm446_vm1, %v453_v14, %v455_v17  ;;  %v460_v33 = vsel %vm446_vm1, %v457_v46, %v459_v5 }
  0x7e   :  { %v202_v10 = vsel %vm200_vm9, %v201_v27, %v1047_v23  ;;  %v970_v32 = vadd.s32 4294967294, %v377_v25  ;;  %v521_v34 = vshrl.u32 %v520_v3, 23  ;;  %v452_v40 = vsel %vm446_vm1, %v449_v39, %v451_v15 }
  0x7f   :  { %v199_v35 = vsel %vm197_vm10, %v1045_v19, %v198_v30  ;;  %v1418_v58 = vmul.u32.u64.low %v1340_v8, %v460_v33  ;;  %v1419_v38 = vmul.u32.u64.high %v1340_v8, %v460_v33, %v1418_v58  ;;  %v299_v7 = vand.u32 3, %v298_v44 }
  0x80   :  { %v203_v41 = vsel %vm196_vm12, %v199_v35, %v202_v10  ;;  %vm971_vm3 = vcmp.lt.s32.totalorder %v970_v32, 0  ;;  %v1424_v42 = vmul.u32.u64.low %v1340_v8, %v456_v31  ;;  %v1425_v45 = vmul.u32.u64.high %v1340_v8, %v456_v31, %v1424_v42 }
  0x81   :  { %v204_v48 = vsel %vm193_vm13, nan, %v203_v41  ;;  %v380_v29 = vsel %vm971_vm3, 0, %v970_v32  ;;  %v976_v21 = vadd.s32 4294967169, %v521_v34  ;;  %v398_v47 = vsel %vm1381_vm2, 0, %v396_v51 }
  0x82   :  { %v381_v60 = vsub.s32 32, %v380_v29  ;;  %v382_v61 = vshll.u32 %v1370_v63, %v380_v29  ;;  %v385_v37 = vsub.s32 4294967266, %v380_v29  ;;  %933 = vst [vmem:[#allocation5] sm:$0xff] %v204_v48  ;;  %v468_v1 = vmul.u32 %v1340_v8, %v452_v40 }
  0x83   :  { %vm470_vm4 = vc.u32 %v1419_v38, %v1424_v42  ;;  %v527_v59 = vadd.s32 1, %v976_v21  ;;  %vm297_vm5 = vweird.f32 %v1162_v52  ;;  %v471_v3 = vadd.s32 1, %v1425_v45 }
  0x84   :  { %v383_v49 = vshrl.u32 %v365_v62, %v381_v60  ;;  %v386_v44 = vadd.s32 127, %v385_v37  ;;  %vm304_vm6 = vcmp.eq.s32.totalorder %v299_v7, 2  ;;  %v402_v55 = vadd.s32 3, %v398_v47 }
  0x85   :  { %v517_v63 = vand.u32 2147483647, %v1160_v50  ;;  %vm528_vm7 = vcmp.gt.s32.totalorder %v527_v59, 0  ;;  %v1049_v4 = vpop.eup %1048  ;;  %v472_v8 = vsel %vm470_vm4, %v471_v3, %v1425_v45  ;;  %vm301_vm8 = vcmp.eq.s32.totalorder %v299_v7, 0 }
  0x86   :  { %v384_v6 = vor.u32 %v383_v49, %v382_v61  ;;  %v387_v2 = vshll.u32 %v386_v44, 23  ;;  %v529_v43 = vsel %vm528_vm7, %v527_v59, 0  ;;  %v1051_v16 = vpop.eup %1050  ;;  %v305_v9 = vxor.u32 2147483648, %v1049_v4 }
  0x87   :  { %v473_v13 = vadd.s32 %v472_v8, %v468_v1  ;;  %v531_v14 = vand.u32 31, %v529_v43  ;;  %vm300_vm9 = vcmp.lt.s32.totalorder %v299_v7, 2  ;;  %v302_v62 = vxor.u32 2147483648, %v1051_v16 }
  0x88   :  { %v388_v17 = vor.u32 4788187, %v387_v2  ;;  %v391_v19 = vcvt.s32.f32 %v384_v6  ;;  %v306_v0 = vsel %vm304_vm6, %v305_v9, %v1051_v16  ;;  %v524_v46 = vand.u32 8388607, %v517_v63 }
  0x89   :  { %v474_v39 = vadd.s32 536870912, %v473_v13  ;;  %v532_v5 = vsub.s32 32, %v531_v14  ;;  %v303_v23 = vsel %vm301_vm8, %v1049_v4, %v302_v62  ;;  %v1443_v25 = vand.u32 3, %v402_v55 }
  0x8a   :  { %v389_v27 = vand.u32 2147483647, %v388_v17  ;;  %v530_v15 = vshrl.u32 %v529_v43, 5  ;;  %v307_v30 = vsel %vm300_vm9, %v303_v23, %v306_v0  ;;  %v534_v31 = vshll.u32 %v1127_v20, %v531_v14 }
  0x8b   :  { %v1445_v51 = vshrl.u32 %v474_v39, 30  ;;  %v537_v10 = vshll.u32 %v1128_v22, %v531_v14  ;;  %v308_v32 = vsel %vm297_vm5, nan, %v307_v30  ;;  %v535_v34 = vshrl.u32 %v1128_v22, %v532_v5 }
  0x8c   :  { %v392_v33 = vmul.f32 %v391_v19, %v389_v27  ;;  %v538_v35 = vshrl.u32 %v1129_v24, %v532_v5  ;;  %v540_v58 = vshll.u32 %v1129_v24, %v531_v14  ;;  %v541_v41 = vshrl.u32 %v1130_v26, %v532_v5  ;;  %934 = vst [vmem:[#allocation5 + $0x8] sm:$0xff] %v308_v32 }
  0x8d   :  { %v476_v40 = vshll.u32 %v1445_v51, 30  ;;  %v543_v45 = vshll.u32 %v1130_v26, %v531_v14  ;;  %v525_v7 = vor.u32 8388608, %v524_v46  ;;  %v544_v29 = vshrl.u32 %v1131_v28, %v532_v5 }
  0x8e   :  { %v393_v48 = vxor.u32 2147483648, %v392_v33  ;;  %v624_v52 = vand.u32 2139095040, %v1164_v53  ;;  %v533_v60 = vshrl.u32 %v1127_v20, %v532_v5  ;;  %v546_v61 = vshll.u32 %v1131_v28, %v531_v14 }
  0x8f   :  { %v1459_v21 = vsub.s32 %v473_v13, %v476_v40  ;;  %v547_v37 = vshrl.u32 %v1132_v36, %v532_v5  ;;  %v536_v1 = vor.u32 %v535_v34, %v534_v31  ;;  %v539_v59 = vor.u32 %v538_v35, %v537_v10 }
  0x90   :  { %v394_v47 = vsel %vm311_vm11, %v393_v48, %v392_v33  ;;  %v545_v49 = vor.u32 %v544_v29, %v543_v45  ;;  %v542_v55 = vor.u32 %v541_v41, %v540_v58  ;;  %vm549_vm10 = vcmp.lt.s32.totalorder %v530_v15, 1 }
  0x91   :  { %v397_v44 = vsel %vm1381_vm2, %v1169_v56, %v394_v47  ;;  %v479_v3 = vsub.s32 0, %v1459_v21  ;;  %v548_v4 = vor.u32 %v547_v37, %v546_v61  ;;  %vm552_vm12 = vcmp.lt.s32.totalorder %v530_v15, 4 }
  0x92   :  { %1052 = vcosq.f32 %v397_v44  ;;  %v625_v6 = vshrl.u32 %v624_v52, 23  ;;  %vm551_vm13 = vcmp.lt.s32.totalorder %v530_v15, 3  ;;  %v565_v8 = vshll.u32 %v525_v7, 8 }
  0x93   :  { %1054 = vsinq.f32 %v397_v44  ;;  %v973_v2 = vmin.u32 %v479_v3, %v1459_v21  ;;  %vm415_vm11 = vcmp.lt.s32.totalorder %v1181_v12, 0  ;;  %vm550_vm14 = vcmp.lt.s32.totalorder %v530_v15, 2 }
  0x94   :  { %v554_v43 = vsel %vm552_vm12, %v542_v55, 2102212464  ;;  %v557_v18 = vsel %vm549_vm10, %v536_v1, %v539_v59  ;;  %v558_v16 = vsel %vm552_vm12, %v545_v49, 920167782  ;;  %v469_v9 = vadd.s32 %v1424_v42, %v1419_v38 }
  0x95   :  { %v481_v13 = vclz %v973_v2  ;;  %v553_v14 = vsel %vm549_vm10, %v533_v60, %v536_v1  ;;  %v561_v62 = vsel %vm549_vm10, %v539_v59, %v542_v55  ;;  %v555_v17 = vsel %vm551_vm13, %v539_v59, %v554_v43 }
  0x96   :  { %v559_v19 = vsel %vm551_vm13, %v542_v55, %v558_v16  ;;  %v562_v0 = vsel %vm552_vm12, %v548_v4, 1326507024  ;;  %v980_v39 = vadd.s32 4294967169, %v625_v6  ;;  %vm401_vm15 = vweird.f32 %v1169_v56 }
  0x97   :  { %v974_v46 = vadd.s32 4294967294, %v481_v13  ;;  %v560_v5 = vsel %vm550_vm14, %v557_v18, %v559_v19  ;;  %v563_v23 = vsel %vm551_vm13, %v545_v49, %v562_v0  ;;  %v621_v38 = vand.u32 2147483647, %v1164_v53 }
  0x98   :  { %v499_v42 = vsub.s32 4, %v1445_v51  ;;  %v564_v27 = vsel %vm550_vm14, %v561_v62, %v563_v23  ;;  %v1488_v30 = vmul.u32.u64.low %v565_v8, %v560_v5  ;;  %v1489_v31 = vmul.u32.u64.high %v565_v8, %v560_v5, %v1488_v30 }
  0x99   :  { %vm975_vm0 = vcmp.lt.s32.totalorder %v974_v46, 0  ;;  %v556_v10 = vsel %vm550_vm14, %v553_v14, %v555_v17  ;;  %v1493_v32 = vmul.u32.u64.low %v565_v8, %v564_v27  ;;  %v1494_v33 = vmul.u32.u64.high %v565_v8, %v564_v27, %v1493_v32 }
  0x9a   :  { %vm405_vm1 = vcmp.eq.s32.totalorder %v1443_v25, 0  ;;  %vm1499_vm2 = vcmp.le.f32.partialorder %v413_v11, 0.7853982  ;;  %v484_v35 = vsel %vm975_vm0, 0, %v974_v46  ;;  %v631_v40 = vadd.s32 1, %v980_v39 }
  0x9b   :  { %vm408_vm3 = vcmp.eq.s32.totalorder %v1443_v25, 2  ;;  %v485_v58 = vsub.s32 32, %v484_v35  ;;  %v486_v41 = vshll.u32 %v1459_v21, %v484_v35  ;;  %v489_v15 = vsub.s32 4294967266, %v484_v35 }
  0x9c   :  { %v1053_v45 = vpop.eup %1052  ;;  %v572_v48 = vmul.u32 %v565_v8, %v556_v10  ;;  %v575_v7 = vadd.s32 1, %v1489_v31  ;;  %v628_v29 = vand.u32 8388607, %v621_v38  ;;  %vm632_vm4 = vcmp.gt.s32.totalorder %v631_v40, 0 }
  0x9d   :  { %v1055_v11 = vpop.eup %1054  ;;  %v409_v52 = vxor.u32 2147483648, %v1053_v45  ;;  %v487_v60 = vshrl.u32 %v469_v9, %v485_v58  ;;  %v490_v61 = vadd.s32 127, %v489_v15  ;;  %v500_v37 = vsel %vm415_vm11, %v499_v42, %v1445_v51 }
  0x9e   :  { %vm404_vm5 = vcmp.lt.s32.totalorder %v1443_v25, 2  ;;  %v406_v21 = vxor.u32 2147483648, %v1055_v11  ;;  %vm574_vm6 = vc.u32 %v1494_v33, %v1488_v30  ;;  %v633_v47 = vsel %vm632_vm4, %v631_v40, 0 }
  0x9f   :  { %v410_v1 = vsel %vm408_vm3, %v409_v52, %v1055_v11  ;;  %v488_v59 = vor.u32 %v487_v60, %v486_v41  ;;  %v491_v49 = vshll.u32 %v490_v61, 23  ;;  %v576_v44 = vsel %vm574_vm6, %v575_v7, %v1489_v31 }
  0xa0   :  { %v407_v3 = vsel %vm405_vm1, %v1053_v45, %v406_v21  ;;  %v502_v51 = vsel %vm1499_vm2, 0, %v500_v37  ;;  %v577_v55 = vadd.s32 %v576_v44, %v572_v48  ;;  %v635_v4 = vand.u32 31, %v633_v47 }
  0xa1   :  { %v411_v6 = vsel %vm404_vm5, %v407_v3, %v410_v1  ;;  %v492_v2 = vor.u32 4788187, %v491_v49  ;;  %v495_v8 = vcvt.s32.f32 %v488_v59  ;;  %v629_v43 = vor.u32 8388608, %v628_v29 }
  0xa2   :  { %v412_v18 = vsel %vm401_vm15, nan, %v411_v6  ;;  %v578_v16 = vadd.s32 536870912, %v577_v55  ;;  %v634_v9 = vshrl.u32 %v633_v47, 5  ;;  %v636_v13 = vsub.s32 32, %v635_v4 }
  0xa3   :  { %v493_v14 = vand.u32 2147483647, %v492_v2  ;;  %v638_v62 = vshll.u32 %v1127_v20, %v635_v4  ;;  %v641_v25 = vshll.u32 %v1128_v22, %v635_v4  ;;  %v644_v17 = vshll.u32 %v1129_v24, %v635_v4  ;;  %935 = vst [vmem:[#allocation5 + $0x10] sm:$0xff] %v412_v18 }
  0xa4   :  { %v1526_v19 = vshrl.u32 %v578_v16, 30  ;;  %v639_v0 = vshrl.u32 %v1128_v22, %v636_v13  ;;  %v642_v39 = vshrl.u32 %v1129_v24, %v636_v13  ;;  %v647_v56 = vshll.u32 %v1130_v26, %v635_v4 }
  0xa5   :  { %v496_v46 = vmul.f32 %v495_v8, %v493_v14  ;;  %v645_v5 = vshrl.u32 %v1130_v26, %v636_v13  ;;  %v648_v23 = vshrl.u32 %v1131_v28, %v636_v13  ;;  %v650_v42 = vshll.u32 %v1131_v28, %v635_v4 }
  0xa6   :  { %v506_v27 = vadd.s32 3, %v502_v51  ;;  %v580_v31 = vshll.u32 %v1526_v19, 30  ;;  %v728_v10 = vand.u32 2139095040, %v1166_v54  ;;  %v637_v35 = vshrl.u32 %v1127_v20, %v636_v13 }
  0xa7   :  { %v497_v32 = vxor.u32 2147483648, %v496_v46  ;;  %v651_v40 = vshrl.u32 %v1132_v36, %v636_v13  ;;  %v1538_v58 = vshll.u32 %v629_v43, 8  ;;  %v640_v15 = vor.u32 %v639_v0, %v638_v62 }
  0xa8   :  { %v1540_v41 = vsub.s32 %v577_v55, %v580_v31  ;;  %v643_v45 = vor.u32 %v642_v39, %v641_v25  ;;  %v646_v48 = vor.u32 %v645_v5, %v644_v17  ;;  %v649_v29 = vor.u32 %v648_v23, %v647_v56 }
  0xa9   :  { %v498_v7 = vsel %vm415_vm11, %v497_v32, %v496_v46  ;;  %v652_v11 = vor.u32 %v651_v40, %v650_v42  ;;  %vm653_vm7 = vcmp.lt.s32.totalorder %v634_v9, 1  ;;  %vm656_vm8 = vcmp.lt.s32.totalorder %v634_v9, 4 }
  0xaa   :  { %v501_v52 = vsel %vm1499_vm2, %v1181_v12, %v498_v7  ;;  %v583_v60 = vsub.s32 0, %v1540_v41  ;;  %v729_v61 = vshrl.u32 %v728_v10, 23  ;;  %vm654_vm9 = vcmp.lt.s32.totalorder %v634_v9, 2 }
  0xab   :  { %1056 = vcosq.f32 %v501_v52  ;;  %vm655_vm10 = vcmp.lt.s32.totalorder %v634_v9, 3  ;;  %v658_v37 = vsel %vm656_vm8, %v646_v48, 2102212464  ;;  %v657_v47 = vsel %vm653_vm7, %v637_v35, %v640_v15 }
  0xac   :  { %1058 = vsinq.f32 %v501_v52  ;;  %v977_v21 = vmin.u32 %v583_v60, %v1540_v41  ;;  %v661_v1 = vsel %vm653_vm7, %v640_v15, %v643_v45  ;;  %v659_v59 = vsel %vm655_vm10, %v643_v45, %v658_v37 }
  0xad   :  { %v662_v49 = vsel %vm656_vm8, %v649_v29, 920167782  ;;  %v665_v44 = vsel %vm653_vm7, %v643_v45, %v646_v48  ;;  %v666_v3 = vsel %vm656_vm8, %v652_v11, 1326507024  ;;  %v507_v51 = vand.u32 3, %v506_v27 }
  0xae   :  { %v585_v34 = vclz %v977_v21  ;;  %v663_v55 = vsel %vm655_vm10, %v646_v48, %v662_v49  ;;  %v667_v4 = vsel %vm655_vm10, %v649_v29, %v666_v3  ;;  %v725_v6 = vand.u32 2147483647, %v1166_v54 }
  0xaf   :  { %v984_v2 = vadd.s32 4294967169, %v729_v61  ;;  %vm505_vm12 = vweird.f32 %v1181_v12  ;;  %v660_v43 = vsel %vm654_vm9, %v657_v47, %v659_v59  ;;  %v664_v18 = vsel %vm654_vm9, %v661_v1, %v663_v55 }
  0xb0   :  { %v978_v8 = vadd.s32 4294967294, %v585_v34  ;;  %v668_v16 = vsel %vm654_vm9, %v665_v44, %v667_v4  ;;  %v1559_v62 = vmul.u32.u64.low %v1538_v58, %v664_v18  ;;  %v1560_v25 = vmul.u32.u64.high %v1538_v58, %v664_v18, %v1559_v62 }
  0xb1   :  { %v1555_v13 = vmul.u32.u64.low %v1538_v58, %v668_v16  ;;  %v1556_v14 = vmul.u32.u64.high %v1538_v58, %v668_v16, %v1555_v13  ;;  %vm519_vm13 = vcmp.lt.s32.totalorder %v1160_v50, 0  ;;  %v573_v17 = vadd.s32 %v1488_v30, %v1494_v33 }
  0xb2   :  { %vm979_vm11 = vcmp.lt.s32.totalorder %v978_v8, 0  ;;  %v735_v0 = vadd.s32 1, %v984_v2  ;;  %vm512_vm14 = vcmp.eq.s32.totalorder %v507_v51, 2  ;;  %v603_v9 = vsub.s32 4, %v1526_v19 }
  0xb3   :  { %v588_v39 = vsel %vm979_vm11, 0, %v978_v8  ;;  %v676_v56 = vmul.u32 %v1538_v58, %v660_v43  ;;  %vm1571_vm0 = vcmp.le.f32.partialorder %v517_v63, 0.7853982  ;;  %vm678_vm1 = vc.u32 %v1556_v14, %v1559_v62 }
  0xb4   :  { %v589_v46 = vsub.s32 32, %v588_v39  ;;  %v590_v5 = vshll.u32 %v1540_v41, %v588_v39  ;;  %v593_v23 = vsub.s32 4294967266, %v588_v39  ;;  %vm736_vm15 = vcmp.gt.s32.totalorder %v735_v0, 0 }
  0xb5   :  { %v1057_v42 = vpop.eup %1056  ;;  %v679_v30 = vadd.s32 1, %v1560_v25  ;;  %v732_v33 = vand.u32 8388607, %v725_v6  ;;  %v737_v31 = vsel %vm736_vm15, %v735_v0, 0  ;;  %vm509_vm2 = vcmp.eq.s32.totalorder %v507_v51, 0 }
  0xb6   :  { %v1059_v10 = vpop.eup %1058  ;;  %v513_v32 = vxor.u32 2147483648, %v1057_v42  ;;  %v591_v35 = vshrl.u32 %v573_v17, %v589_v46  ;;  %v594_v40 = vadd.s32 127, %v593_v23  ;;  %vm508_vm3 = vcmp.lt.s32.totalorder %v507_v51, 2 }
  0xb7   :  { %v510_v58 = vxor.u32 2147483648, %v1059_v10  ;;  %v680_v63 = vsel %vm678_vm1, %v679_v30, %v1560_v25  ;;  %v739_v41 = vand.u32 31, %v737_v31  ;;  %v604_v11 = vsel %vm519_vm13, %v603_v9, %v1526_v19 }
  0xb8   :  { %v514_v15 = vsel %vm512_vm14, %v513_v32, %v1059_v10  ;;  %v592_v45 = vor.u32 %v591_v35, %v590_v5  ;;  %v595_v48 = vshll.u32 %v594_v40, 23  ;;  %v681_v7 = vadd.s32 %v680_v63, %v676_v56 }
  0xb9   :  { %v511_v29 = vsel %vm509_vm2, %v1057_v42, %v510_v58  ;;  %v733_v52 = vor.u32 8388608, %v732_v33  ;;  %v740_v60 = vsub.s32 32, %v739_v41  ;;  %v738_v59 = vshrl.u32 %v737_v31, 5 }
  0xba   :  { %v515_v61 = vsel %vm508_vm3, %v511_v29, %v514_v15  ;;  %v596_v37 = vor.u32 4788187, %v595_v48  ;;  %v599_v21 = vcvt.s32.f32 %v592_v45  ;;  %v682_v47 = vadd.s32 536870912, %v681_v7 }
  0xbb   :  { %v516_v1 = vsel %vm505_vm12, nan, %v515_v61  ;;  %v742_v49 = vshll.u32 %v1127_v20, %v739_v41  ;;  %v745_v44 = vshll.u32 %v1128_v22, %v739_v41  ;;  %v743_v34 = vshrl.u32 %v1128_v22, %v740_v60 }
  0xbc   :  { %v597_v3 = vand.u32 2147483647, %v596_v37  ;;  %v1589_v51 = vshrl.u32 %v682_v47, 30  ;;  %v746_v19 = vshrl.u32 %v1129_v24, %v740_v60  ;;  %936 = vst [vmem:[#allocation5 + $0x18] sm:$0xff] %v516_v1  ;;  %v748_v55 = vshll.u32 %v1129_v24, %v739_v41 }
  0xbd   :  { %v749_v4 = vshrl.u32 %v1130_v26, %v740_v60  ;;  %v751_v12 = vshll.u32 %v1130_v26, %v739_v41  ;;  %v752_v2 = vshrl.u32 %v1131_v28, %v740_v60  ;;  %v606_v43 = vsel %vm1571_vm0, 0, %v604_v11 }
  0xbe   :  { %v600_v8 = vmul.f32 %v599_v21, %v597_v3  ;;  %v684_v18 = vshll.u32 %v1589_v51, 30  ;;  %v1600_v16 = vshll.u32 %v733_v52, 8  ;;  %v741_v13 = vshrl.u32 %v1127_v20, %v740_v60 }
  0xbf   :  { %v753_v25 = vor.u32 %v752_v2, %v751_v12  ;;  %v754_v17 = vshll.u32 %v1131_v28, %v739_v41  ;;  %v755_v0 = vshrl.u32 %v1132_v36, %v740_v60  ;;  %v744_v56 = vor.u32 %v743_v34, %v742_v49 }
  0xc0   :  { %v601_v39 = vxor.u32 2147483648, %v600_v8  ;;  %v1605_v9 = vsub.s32 %v681_v7, %v684_v18  ;;  %v747_v46 = vor.u32 %v746_v19, %v745_v44  ;;  %v750_v5 = vor.u32 %v749_v4, %v748_v55 }
  0xc1   :  { %vm757_vm4 = vcmp.lt.s32.totalorder %v738_v59, 1  ;;  %vm758_vm5 = vcmp.lt.s32.totalorder %v738_v59, 2  ;;  %vm760_vm6 = vcmp.lt.s32.totalorder %v738_v59, 4  ;;  %v756_v30 = vor.u32 %v755_v0, %v754_v17 }
  0xc2   :  { %v602_v23 = vsel %vm519_vm13, %v601_v39, %v600_v8  ;;  %v687_v42 = vsub.s32 0, %v1605_v9  ;;  %vm759_vm7 = vcmp.lt.s32.totalorder %v738_v59, 3  ;;  %v761_v31 = vsel %vm757_vm4, %v741_v13, %v744_v56 }
  0xc3   :  { %v605_v33 = vsel %vm1571_vm0, %v1160_v50, %v602_v23  ;;  %v762_v10 = vsel %vm760_vm6, %v750_v5, 2102212464  ;;  %v766_v32 = vsel %vm760_vm6, %v753_v25, 920167782  ;;  %v765_v58 = vsel %vm757_vm4, %v744_v56, %v747_v46 }
  0xc4   :  { %1060 = vcosq.f32 %v605_v33  ;;  %v981_v35 = vmin.u32 %v687_v42, %v1605_v9  ;;  %v763_v40 = vsel %vm759_vm7, %v747_v46, %v762_v10  ;;  %v610_v63 = vadd.s32 3, %v606_v43 }
  0xc5   :  { %1062 = vsinq.f32 %v605_v33  ;;  %v767_v41 = vsel %vm759_vm7, %v750_v5, %v766_v32  ;;  %v832_v27 = vand.u32 2139095040, %v1171_v57  ;;  %v769_v45 = vsel %vm757_vm4, %v747_v46, %v750_v5 }
  0xc6   :  { %v689_v15 = vclz %v981_v35  ;;  %v764_v48 = vsel %vm758_vm5, %v761_v31, %v763_v40  ;;  %v768_v7 = vsel %vm758_vm5, %v765_v58, %v767_v41  ;;  %v770_v29 = vsel %vm760_vm6, %v756_v30, 1326507024 }
  0xc7   :  { %v771_v52 = vsel %vm759_vm7, %v753_v25, %v770_v29  ;;  %v1627_v60 = vmul.u32.u64.low %v1600_v16, %v768_v7  ;;  %v1628_v61 = vmul.u32.u64.high %v1600_v16, %v768_v7, %v1627_v60  ;;  %v611_v37 = vand.u32 3, %v610_v63 }
  0xc8   :  { %v982_v11 = vadd.s32 4294967294, %v689_v15  ;;  %v772_v21 = vsel %vm758_vm5, %v769_v45, %v771_v52  ;;  %v833_v47 = vshrl.u32 %v832_v27, 23  ;;  %v677_v1 = vadd.s32 %v1559_v62, %v1556_v14 }
  0xc9   :  { %v1635_v49 = vmul.u32.u64.low %v1600_v16, %v772_v21  ;;  %v1636_v44 = vmul.u32.u64.high %v1600_v16, %v772_v21, %v1635_v49  ;;  %vm609_vm9 = vweird.f32 %v1160_v50  ;;  %v780_v34 = vmul.u32 %v1600_v16, %v764_v48 }
  0xca   :  { %vm983_vm8 = vcmp.lt.s32.totalorder %v982_v11, 0  ;;  %v988_v19 = vadd.s32 4294967169, %v833_v47  ;;  %v783_v12 = vadd.s32 1, %v1628_v61  ;;  %vm612_vm10 = vcmp.lt.s32.totalorder %v611_v37, 2 }
  0xcb   :  { %v692_v3 = vsel %vm983_vm8, 0, %v982_v11  ;;  %vm623_vm12 = vcmp.lt.s32.totalorder %v1164_v53, 0  ;;  %v707_v14 = vsub.s32 4, %v1589_v51  ;;  %vm616_vm13 = vcmp.eq.s32.totalorder %v611_v37, 2 }
  0xcc   :  { %v693_v55 = vsub.s32 32, %v692_v3  ;;  %v694_v4 = vshll.u32 %v1605_v9, %v692_v3  ;;  %v697_v59 = vsub.s32 4294967266, %v692_v3  ;;  %v839_v62 = vadd.s32 1, %v988_v19 }
  0xcd   :  { %vm782_vm11 = vc.u32 %v1636_v44, %v1627_v60  ;;  %vm613_vm14 = vcmp.eq.s32.totalorder %v611_v37, 0  ;;  %v708_v56 = vsel %vm623_vm12, %v707_v14, %v1589_v51  ;;  %v829_v46 = vand.u32 2147483647, %v1171_v57 }
  0xce   :  { %v1061_v2 = vpop.eup %1060  ;;  %v695_v8 = vshrl.u32 %v677_v1, %v693_v55  ;;  %v698_v43 = vadd.s32 127, %v697_v59  ;;  %v784_v13 = vsel %vm782_vm11, %v783_v12, %v1628_v61  ;;  %vm840_vm15 = vcmp.gt.s32.totalorder %v839_v62, 0 }
  0xcf   :  { %v1063_v18 = vpop.eup %1062  ;;  %v617_v16 = vxor.u32 2147483648, %v1061_v2  ;;  %v785_v39 = vadd.s32 %v784_v13, %v780_v34  ;;  %v841_v5 = vsel %vm840_vm15, %v839_v62, 0  ;;  %vm1656_vm0 = vcmp.le.f32.partialorder %v621_v38, 0.7853982 }
  0xd0   :  { %v614_v25 = vxor.u32 2147483648, %v1063_v18  ;;  %v696_v17 = vor.u32 %v695_v8, %v694_v4  ;;  %v699_v0 = vshll.u32 %v698_v43, 23  ;;  %v843_v10 = vand.u32 31, %v841_v5 }
  0xd1   :  { %v618_v9 = vsel %vm616_vm13, %v617_v16, %v1063_v18  ;;  %v786_v33 = vadd.s32 536870912, %v785_v39  ;;  %v710_v58 = vsel %vm1656_vm0, 0, %v708_v56  ;;  %v836_v63 = vand.u32 8388607, %v829_v46 }
  0xd2   :  { %v615_v23 = vsel %vm613_vm14, %v1061_v2, %v614_v25  ;;  %v700_v42 = vor.u32 4788187, %v699_v0  ;;  %v703_v30 = vcvt.s32.f32 %v696_v17  ;;  %v842_v41 = vshrl.u32 %v841_v5, 5 }
  0xd3   :  { %v619_v31 = vsel %vm612_vm10, %v615_v23, %v618_v9  ;;  %v1660_v40 = vshrl.u32 %v786_v33, 30  ;;  %v844_v27 = vsub.s32 32, %v843_v10  ;;  %v846_v38 = vshll.u32 %v1127_v20, %v843_v10 }
  0xd4   :  { %v620_v32 = vsel %vm609_vm9, nan, %v619_v31  ;;  %v701_v51 = vand.u32 2147483647, %v700_v42  ;;  %v849_v45 = vshll.u32 %v1128_v22, %v843_v10  ;;  %v852_v29 = vshll.u32 %v1129_v24, %v843_v10 }
  0xd5   :  { %937 = vst [vmem:[#allocation5 + $0x20] sm:$0xff] %v620_v32  ;;  %v788_v15 = vshll.u32 %v1660_v40, 30  ;;  %v847_v48 = vshrl.u32 %v1128_v22, %v844_v27  ;;  %v850_v7 = vshrl.u32 %v1129_v24, %v844_v27  ;;  %v855_v11 = vshll.u32 %v1130_v26, %v843_v10 }
  0xd6   :  { %v704_v50 = vmul.f32 %v703_v30, %v701_v51  ;;  %v853_v37 = vshrl.u32 %v1130_v26, %v844_v27  ;;  %v856_v21 = vshrl.u32 %v1131_v28, %v844_v27  ;;  %v714_v47 = vadd.s32 3, %v710_v58 }
  0xd7   :  { %v789_v61 = vsub.s32 %v785_v39, %v788_v15  ;;  %v837_v1 = vor.u32 8388608, %v836_v63  ;;  %v845_v49 = vshrl.u32 %v1127_v20, %v844_v27  ;;  %v848_v34 = vor.u32 %v847_v48, %v846_v38 }
  0xd8   :  { %v705_v52 = vxor.u32 2147483648, %v704_v50  ;;  %v851_v19 = vor.u32 %v850_v7, %v849_v45  ;;  %v857_v55 = vor.u32 %v856_v21, %v855_v11  ;;  %v858_v4 = vshll.u32 %v1131_v28, %v843_v10 }
  0xd9   :  { %v791_v22 = vsub.s32 0, %v789_v61  ;;  %v859_v26 = vshrl.u32 %v1132_v36, %v844_v27  ;;  %v854_v12 = vor.u32 %v853_v37, %v852_v29  ;;  %vm861_vm1 = vcmp.lt.s32.totalorder %v842_v41, 1 }
  0xda   :  { %v706_v3 = vsel %vm623_vm12, %v705_v52, %v704_v50  ;;  %vm863_vm2 = vcmp.lt.s32.totalorder %v842_v41, 3  ;;  %vm864_vm3 = vcmp.lt.s32.totalorder %v842_v41, 4  ;;  %vm862_vm4 = vcmp.lt.s32.totalorder %v842_v41, 2 }
  0xdb   :  { %v709_v24 = vsel %vm1656_vm0, %v1164_v53, %v706_v3  ;;  %v985_v59 = vmin.u32 %v791_v22, %v789_v61  ;;  %v860_v20 = vor.u32 %v859_v26, %v858_v4  ;;  %v877_v62 = vshll.u32 %v837_v1, 8 }
  0xdc   :  { %1064 = vcosq.f32 %v709_v24  ;;  %v715_v2 = vand.u32 3, %v714_v47  ;;  %v866_v8 = vsel %vm864_vm3, %v854_v12, 2102212464  ;;  %v869_v43 = vsel %vm861_vm1, %v848_v34, %v851_v19 }
  0xdd   :  { %1066 = vsinq.f32 %v709_v24  ;;  %v793_v14 = vclz %v985_v59  ;;  %v870_v18 = vsel %vm864_vm3, %v857_v55, 920167782  ;;  %v781_v28 = vadd.s32 %v1627_v60, %v1636_v44 }
  0xde   :  { %v871_v16 = vsel %vm863_vm2, %v854_v12, %v870_v18  ;;  %v873_v13 = vsel %vm861_vm1, %v851_v19, %v854_v12  ;;  %v865_v25 = vsel %vm861_vm1, %v845_v49, %v848_v34  ;;  %v867_v17 = vsel %vm863_vm2, %v851_v19, %v866_v8 }
  0xdf   :  { %v986_v36 = vadd.s32 4294967294, %v793_v14  ;;  %v872_v0 = vsel %vm862_vm4, %v869_v43, %v871_v16  ;;  %v874_v39 = vsel %vm864_vm3, %v860_v20, 1326507024  ;;  %v868_v33 = vsel %vm862_vm4, %v865_v25, %v867_v17 }
  0xe0   :  { %v875_v9 = vsel %vm863_vm2, %v857_v55, %v874_v39  ;;  %v1692_v56 = vmul.u32.u64.low %v877_v62, %v872_v0  ;;  %v1693_v5 = vmul.u32.u64.high %v877_v62, %v872_v0, %v1692_v56  ;;  %vm720_vm6 = vcmp.eq.s32.totalorder %v715_v2, 2 }
  0xe1   :  { %vm987_vm5 = vcmp.lt.s32.totalorder %v986_v36, 0  ;;  %v876_v60 = vsel %vm862_vm4, %v873_v13, %v875_v9  ;;  %vm717_vm7 = vcmp.eq.s32.totalorder %v715_v2, 0  ;;  %v884_v50 = vmul.u32 %v877_v62, %v868_v33 }
  0xe2   :  { %v796_v23 = vsel %vm987_vm5, 0, %v986_v36  ;;  %v1697_v31 = vmul.u32.u64.low %v877_v62, %v876_v60  ;;  %v1698_v10 = vmul.u32.u64.high %v877_v62, %v876_v60, %v1697_v31  ;;  %v887_v58 = vadd.s32 1, %v1693_v5 }
  0xe3   :  { %v797_v44 = vsub.s32 32, %v796_v23  ;;  %v798_v42 = vshll.u32 %v789_v61, %v796_v23  ;;  %v801_v30 = vsub.s32 4294967266, %v796_v23  ;;  %vm716_vm8 = vcmp.lt.s32.totalorder %v715_v2, 2 }
  0xe4   :  { %vm713_vm9 = vweird.f32 %v1164_v53  ;;  %vm886_vm10 = vc.u32 %v1698_v10, %v1692_v56  ;;  %v811_v47 = vsub.s32 4, %v1660_v40  ;;  %vm727_vm12 = vcmp.lt.s32.totalorder %v1166_v54, 0 }
  0xe5   :  { %v799_v35 = vshrl.u32 %v781_v28, %v797_v44  ;;  %v802_v51 = vadd.s32 127, %v801_v30  ;;  %v888_v11 = vsel %vm886_vm10, %v887_v58, %v1693_v5  ;;  %vm726_vm13 = vcmp.le.f32.partialorder %v725_v6, 0.7853982 }
  0xe6   :  { %v1065_v32 = vpop.eup %1064  ;;  %v889_v61 = vadd.s32 %v888_v11, %v884_v50  ;;  %v812_v22 = vsel %vm727_vm12, %v811_v47, %v1660_v40  ;;  %v885_v2 = vadd.s32 %v1692_v56, %v1698_v10  ;;  %vm817_vm1 = vweird.f32 %v1166_v54 }
  0xe7   :  { %v1067_v63 = vpop.eup %1066  ;;  %v721_v27 = vxor.u32 2147483648, %v1065_v32  ;;  %v800_v38 = vor.u32 %v799_v35, %v798_v42  ;;  %v803_v45 = vshll.u32 %v802_v51, 23  ;;  %v814_v55 = vsel %vm726_vm13, 0, %v812_v22 }
  0xe8   :  { %v718_v15 = vxor.u32 2147483648, %v1067_v63  ;;  %v890_v1 = vadd.s32 536870912, %v889_v61  ;;  %v818_v59 = vadd.s32 3, %v814_v55  ;;  %vm831_vm2 = vcmp.lt.s32.totalorder %v1171_v57, 0 }
  0xe9   :  { %v722_v41 = vsel %vm720_vm6, %v721_v27, %v1067_v63  ;;  %v804_v7 = vor.u32 4788187, %v803_v45  ;;  %v807_v29 = vcvt.s32.f32 %v800_v38  ;;  %vm830_vm3 = vcmp.le.f32.partialorder %v829_v46, 0.7853982 }
  0xea   :  { %v719_v48 = vsel %vm717_vm7, %v1065_v32, %v718_v15  ;;  %v891_v53 = vshrl.u32 %v890_v1, 30  ;;  %v819_v14 = vand.u32 3, %v818_v59  ;;  %vm921_vm7 = vweird.f32 %v1171_v57 }
  0xeb   :  { %v723_v52 = vsel %vm716_vm8, %v719_v48, %v722_v41  ;;  %v805_v21 = vand.u32 2147483647, %v804_v7 }
  0xec   :  { %v724_v37 = vsel %vm713_vm9, nan, %v723_v52  ;;  %v892_v34 = vshll.u32 %v891_v53, 30  ;;  %vm821_vm14 = vcmp.eq.s32.totalorder %v819_v14, 0  ;;  %vm824_vm15 = vcmp.eq.s32.totalorder %v819_v14, 2 }
  0xed   :  { %938 = vst [vmem:[#allocation5 + $0x28] sm:$0xff] %v724_v37  ;;  %v808_v49 = vmul.f32 %v807_v29, %v805_v21  ;;  %vm820_vm0 = vcmp.lt.s32.totalorder %v819_v14, 2  ;;  %v915_v42 = vsub.s32 4, %v891_v53 }
  0xee   :  { %v893_v4 = vsub.s32 %v889_v61, %v892_v34 }
  0xef   :  { %v809_v3 = vxor.u32 2147483648, %v808_v49  ;;  %v916_v33 = vsel %vm831_vm2, %v915_v42, %v891_v53 }
  0xf0   :  { %v895_v26 = vsub.s32 0, %v893_v4  ;;  %v918_v32 = vsel %vm830_vm3, 0, %v916_v33 }
  0xf1   :  { %v810_v19 = vsel %vm727_vm12, %v809_v3, %v808_v49  ;;  %v922_v35 = vadd.s32 3, %v918_v32 }
  0xf2   :  { %v813_v24 = vsel %vm726_vm13, %v1166_v54, %v810_v19  ;;  %v989_v12 = vmin.u32 %v895_v26, %v893_v4 }
  0xf3   :  { %1068 = vcosq.f32 %v813_v24  ;;  %v923_v51 = vand.u32 3, %v922_v35 }
  0xf4   :  { %1070 = vsinq.f32 %v813_v24  ;;  %v897_v20 = vclz %v989_v12 }
  0xf5   :  { %vm928_vm4 = vcmp.eq.s32.totalorder %v923_v51, 2  ;;  %vm925_vm5 = vcmp.eq.s32.totalorder %v923_v51, 0  ;;  %vm924_vm6 = vcmp.lt.s32.totalorder %v923_v51, 2 }
  0xf6   :  { %v990_v62 = vadd.s32 4294967294, %v897_v20 }
  0xf8   :  { %vm991_vm11 = vcmp.lt.s32.totalorder %v990_v62, 0 }
  0xf9   :  { %v900_v40 = vsel %vm991_vm11, 0, %v990_v62 }
  0xfa   :  { %v901_v18 = vsub.s32 32, %v900_v40  ;;  %v902_v28 = vshll.u32 %v893_v4, %v900_v40  ;;  %v905_v36 = vsub.s32 4294967266, %v900_v40 }
  0xfc   :  { %v903_v25 = vshrl.u32 %v885_v2, %v901_v18  ;;  %v906_v17 = vadd.s32 127, %v905_v36 }
  0xfd   :  { %v1069_v6 = vpop.eup %1068 }
  0xfe   :  { %v1071_v8 = vpop.eup %1070  ;;  %v825_v43 = vxor.u32 2147483648, %v1069_v6  ;;  %v904_v9 = vor.u32 %v903_v25, %v902_v28  ;;  %v907_v56 = vshll.u32 %v906_v17, 23 }
  0xff   :  { %v822_v16 = vxor.u32 2147483648, %v1071_v8 }
 0x100   :  { %v826_v13 = vsel %vm824_vm15, %v825_v43, %v1071_v8  ;;  %v908_v23 = vor.u32 4788187, %v907_v56  ;;  %v911_v60 = vcvt.s32.f32 %v904_v9 }
 0x101   :  { %v823_v0 = vsel %vm821_vm14, %v1069_v6, %v822_v16 }
 0x102   :  { %v827_v39 = vsel %vm820_vm0, %v823_v0, %v826_v13  ;;  %v909_v44 = vand.u32 2147483647, %v908_v23 }
 0x103   :  { %v828_v5 = vsel %vm817_vm1, nan, %v827_v39 }
 0x104   :  { %939 = vst [vmem:[#allocation5 + $0x30] sm:$0xff] %v828_v5  ;;  %v912_v30 = vmul.f32 %v911_v60, %v909_v44 }
 0x106   :  { %v913_v54 = vxor.u32 2147483648, %v912_v30 }
 0x108   :  { %v914_v31 = vsel %vm831_vm2, %v913_v54, %v912_v30 }
 0x109   :  { %v917_v10 = vsel %vm830_vm3, %v1171_v57, %v914_v31 }
 0x10a   :  { %1072 = vcosq.f32 %v917_v10 }
 0x10b   :  { %1074 = vsinq.f32 %v917_v10 }
 0x114   :  { %v1073_v58 = vpop.eup %1072 }
 0x115   :  { %v1075_v63 = vpop.eup %1074  ;;  %v929_v27 = vxor.u32 2147483648, %v1073_v58 }
 0x116   :  { %v926_v50 = vxor.u32 2147483648, %v1075_v63 }
 0x117   :  { %v930_v46 = vsel %vm928_vm4, %v929_v27, %v1075_v63 }
 0x118   :  { %v927_v15 = vsel %vm925_vm5, %v1073_v58, %v926_v50 }
 0x119   :  { %v931_v38 = vsel %vm924_vm6, %v927_v15, %v930_v46 }
 0x11a   :  { %v932_v45 = vsel %vm921_vm7, nan, %v931_v38 }
 0x11b   :  { %940 = vst [vmem:[#allocation5 + $0x38] sm:$0xff] %v932_v45 }
 0x11c   :  { %1109 = shalt.err (!%p1106_p12)
}
 0x11d   :  { %s1110_s24 = scalar_lea.hbm %s1730_s1, 1024 }
 0x11e   :  { %p1111_p13 = scmp.ne.s32.totalorder %s1730_s1, %s1110_s24  ;;  %p1114_p0 = scmp.lt.u32.totalorder %s1110_s24, %s1730_s1 }
 0x120   :  { %p1116_p1 = pnand %p1114_p0, %p1111_p13 }
 0x122   :  { %1119 = shalt.err (!%p1116_p1)
}
 0x123   :  { %s1134_s29 = smov 128   ;;  %s1135_s30 = smov 8  }
 0x124   :  { %952 = dma.vmem_to_hbm [thread:$0]  %s947_s20, 1024, %s1730_s1, [#allocation4], %s1134_s29, %s1134_s29, %s1135_s30  }
 0x125   :  { %1122 = dma.done.wait [#allocation4], 1024  }
 0x126   :  { %1123 = vsyncadd [#allocation4], 4294966272 }
 0x127   :  { %956 = vsyncpa [#allocation3], 1 }
 0x128   :  { %957 = vsyncpa [#allocation4], 1 }

</bundles_post_ra>
